<compile_context>
chip_gen: v7x
topology: tpu7x:2x2x1
jax: 0.10.0
libtpu: 0.0.40
codegen_flags: <defaults>
</compile_context>

<pallas_src>
import jax
import jax.numpy as jnp
from jax.experimental import pallas as pl
from jax.experimental.pallas import tpu as pltpu


def _abs_pos_emb_kernel(q_ref, emb_ref, o_ref):
    # q_ref: (tm, D), emb_ref: (D, J_pad), o_ref: (tm, J_pad)
    # Canonical (M,K)x(K,N) MXU matmul: contraction on q's last dim and emb's
    # first dim -> N (= J_pad, multiple of 128) lands on lanes, so the output
    # store is an unmasked full-width vst.
    o_ref[...] = jnp.dot(
        q_ref[...], emb_ref[...], preferred_element_type=jnp.float32
    ).astype(o_ref.dtype)


def _tensorcores_per_device():
    """Best-effort trace-time check for multi-TensorCore chips (v7x)."""
    try:
        kind = jax.devices()[0].device_kind.lower()
    except Exception:
        return 1
    if "v7" in kind or "7x" in kind:
        return 2
    return 1


def abs_pos_emb(q, height, width):
    """q: (B, heads, I, D); height: (H, D); width: (W, D) -> (B, heads, I, H*W)."""
    B, NH, I, D = q.shape
    H, Dh = height.shape
    W, Dw = width.shape
    assert D == Dh == Dw
    J = H * W
    M = B * NH * I

    # Hoist the embedding construction out of the kernel (built once, ~8 KiB)
    # and pre-transpose to (D, J) so the kernel contracts q's last dim with
    # emb's first dim (no in-kernel RHS transpose).
    emb_t = (height[:, None, :] + width[None, :, :]).reshape(J, D).T  # (D, J)

    # Lane-dense output: pad J up to a multiple of 128 with zero columns.
    J_pad = pl.cdiv(J, 128) * 128
    if J_pad != J:
        emb_t = jnp.pad(emb_t, ((0, 0), (0, J_pad - J)))

    # Fuse batch/head/query rows into a single M dimension -> one matmul.
    q2d = q.reshape(M, D)

    # Grid: single step on single-TC chips (v5e/v6e); 2-way "parallel" split
    # only on multi-TC chips (v7x), when M tiles cleanly into (8,·) blocks.
    num_chunks = 1
    if _tensorcores_per_device() >= 2 and M % 2 == 0 and (M // 2) % 8 == 0:
        num_chunks = 2
    tm = M // num_chunks

    cost = pl.CostEstimate(
        flops=2 * M * D * J_pad,
        transcendentals=0,
        bytes_accessed=(q2d.size * q2d.dtype.itemsize
                        + emb_t.size * emb_t.dtype.itemsize
                        + M * J_pad * q.dtype.itemsize),
    )

    out2d = pl.pallas_call(
        _abs_pos_emb_kernel,
        out_shape=jax.ShapeDtypeStruct((M, J_pad), q.dtype),
        grid_spec=pl.GridSpec(
            grid=(num_chunks,),
            in_specs=[
                pl.BlockSpec((tm, D), lambda i: (i, 0)),     # fused query rows
                pl.BlockSpec((D, J_pad), lambda i: (0, 0)),  # tiny emb, resident
            ],
            out_specs=pl.BlockSpec((tm, J_pad), lambda i: (i, 0)),
        ),
        compiler_params=pltpu.CompilerParams(
            dimension_semantics=("parallel",),
        ),
        cost_estimate=cost,
    )(q2d, emb_t)

    if J_pad != J:
        out2d = out2d[:, :J]   # drop the zero padding columns
    return out2d.reshape(B, NH, I, J)


def abs_pos_emb_reference(q, height, width):
    """Pure-JAX reference mirroring the PyTorch forward."""
    H, D = height.shape
    W = width.shape[0]
    emb = (height[:, None, :] + width[None, :, :]).reshape(H * W, D)
    return jnp.einsum("bhid,jd->bhij", q, emb)


if __name__ == "__main__":
    # Module config: fmap_size=8 -> height=width=8, dim_head=32.
    fmap_size = 8
    dim_head = 32
    Hf = Wf = fmap_size
    scale = dim_head ** (-0.5)

    batch, heads = 2, 4
    seq = Hf * Wf  # queries per head (flattened feature map), = 64

    key = jax.random.PRNGKey(0)
    k_h, k_w, k_q = jax.random.split(key, 3)

    # Deterministic parameter init (matches torch.randn(...) * scale shapes).
    height_param = jax.random.normal(k_h, (Hf, dim_head), dtype=jnp.float32) * scale
    width_param = jax.random.normal(k_w, (Wf, dim_head), dtype=jnp.float32) * scale

    q = jax.random.normal(k_q, (batch, heads, seq, dim_head), dtype=jnp.float32)

    out = abs_pos_emb(q, height_param, width_param)
    out = jax.block_until_ready(out)

    ref = abs_pos_emb_reference(q, height_param, width_param)
    assert out.shape == (batch, heads, seq, Hf * Wf)
    assert jnp.allclose(out, ref, atol=1e-4, rtol=1e-4)

    print("KERNEL_OK")
</pallas_src>

<mosaic_0001>
module attributes {stable_mosaic.version = 11 : i64} {
  func.func @_abs_pos_emb_kernel(%arg0: i32, %arg1: memref<512x32xf32, #tpu.memory_space<vmem>>, %arg2: memref<32x128xf32, #tpu.memory_space<vmem>>, %arg3: memref<512x128xf32, #tpu.memory_space<vmem>>) attributes {dimension_semantics = [#tpu.dimension_semantics<parallel>], iteration_bounds = array<i64: 1>, scalar_prefetch = 0 : i64, scratch_operands = 0 : i64, tpu.core_type = #tpu.core_type<tc>, window_params = [{transform_indices = @transform_0, window_bounds = array<i64: 512, 32>}, {pipeline_mode = #tpu.pipeline_mode<synchronous>, transform_indices = @transform_1, window_bounds = array<i64: 32, 128>}, {transform_indices = @transform_2, window_bounds = array<i64: 512, 128>}]} {
    %c0 = arith.constant 0 : index
    %c0_0 = arith.constant 0 : index
    %0 = vector.load %arg1[%c0, %c0_0] : memref<512x32xf32, #tpu.memory_space<vmem>>, vector<512x32xf32>
    %c0_1 = arith.constant 0 : index
    %c0_2 = arith.constant 0 : index
    %1 = vector.load %arg2[%c0_1, %c0_2] : memref<32x128xf32, #tpu.memory_space<vmem>>, vector<32x128xf32>
    %cst = arith.constant dense<0.000000e+00> : vector<512x128xf32>
    %2 = tpu.matmul %0, %1, %cst {dimension_numbers = #tpu.dot_dimension_numbers<[1], [0], [0], [1], [0, 0, 1, 1], [], []>} : vector<512x32xf32>, vector<32x128xf32>, vector<512x128xf32> -> vector<512x128xf32>
    %c0_3 = arith.constant 0 : index
    %c0_4 = arith.constant 0 : index
    %3 = vector.load %arg3[%c0_3, %c0_4] : memref<512x128xf32, #tpu.memory_space<vmem>>, vector<512x128xf32>
    tpu.vector_store %arg3[%c0_3, %c0_4], %2 {strides = array<i32>} : memref<512x128xf32, #tpu.memory_space<vmem>>, vector<512x128xf32>,
    return
  }
  func.func @transform_0(%arg0: i32) -> (i32, i32) {
    %c0_i32 = arith.constant 0 : i32
    %c0_i32_0 = arith.constant 0 : i32
    return %arg0, %c0_i32 : i32, i32
  }
  func.func @transform_1(%arg0: i32) -> (i32, i32) {
    %c0_i32 = arith.constant 0 : i32
    %c0_i32_0 = arith.constant 0 : i32
    %c0_i32_1 = arith.constant 0 : i32
    return %c0_i32, %c0_i32_0 : i32, i32
  }
  func.func @transform_2(%arg0: i32) -> (i32, i32) {
    %c0_i32 = arith.constant 0 : i32
    %c0_i32_0 = arith.constant 0 : i32
    return %arg0, %c0_i32 : i32, i32
  }
}

</mosaic_0001>

<bundles_post_ra>
// kernel: tpu_custom_call.1
= control target key start
LH: loop header
LB: loop body
LE: loop exit
PB: predicated region body
PF: predicated region fallthrough
CT: control target
= control target key end

     0   :  { %vm80_vm0 = vcmask 261120   ;;  %s1311_s0 = inlined_call_operand.vmem [shape: f32[512,32], index: 0, kind: input, shape index: {}]   ;;  %s1312_s1 = inlined_call_operand.vmem [shape: f32[32,128], index: 1, kind: input, shape index: {}]   ;;  %s1313_s2 = inlined_call_operand.hbm [shape: f32[512,128], index: 2, kind: output, shape index: {}]  }
   0x1   :  { %v76_v0 = vld [vmem:[%s1312_s1] sm:$0xff]  ;;  %v77_v1 = vld [vmem:[%s1312_s1 + $0x8] sm:$0xff]  ;;  %v78_v2 = vld [vmem:[%s1312_s1 + $0x10] sm:$0xff] }
   0x2   :  { %v974_v3 = vpack.c.bf16 %v77_v1, %v76_v0  ;;  %v79_v4 = vld [vmem:[%s1312_s1 + $0x18] sm:$0xff]  ;;  %v12_v5 = vld [vmem:[%s1311_s0] sm:$0xff]  ;;  %v13_v8 = vld [vmem:[%s1311_s0 + $0x8] sm:$0xff] }
   0x3   :  { %v44_v6 = vld [vmem:[%s1311_s0 + $0x100] sm:$0xff]  ;;  %v978_v7 = vpack.c.bf16 %v79_v4, %v78_v2  ;;  %878 = vmatprep.mubr.msk.f32.mxu0 %vm80_vm0, %v12_v5  ;;  %v45_v9 = vld [vmem:[%s1311_s0 + $0x108] sm:$0xff]  ;;  %v14_v10 = vld [vmem:[%s1311_s0 + $0x10] sm:$0xff] }
   0x4   :  { %926 = vmatprep.mubr.msk.f32.mxu1 %vm80_vm0, %v44_v6  ;;  %975 = vmatprep.subr.bf16.mxu0 %v974_v3  ;;  %v46_v11 = vld [vmem:[%s1311_s0 + $0x110] sm:$0xff]  ;;  %v15_v12 = vld [vmem:[%s1311_s0 + $0x18] sm:$0xff]  ;;  %v16_v14 = vld [vmem:[%s1311_s0 + $0x20] sm:$0xff] }
   0x5   :  { %982 = vmatprep.subr.bf16.mxu1 %v974_v3  ;;  %977 = vmatpush3.bf16.msra.mxu0 %v974_v3  ;;  %v47_v13 = vld [vmem:[%s1311_s0 + $0x118] sm:$0xff]  ;;  %v48_v15 = vld [vmem:[%s1311_s0 + $0x120] sm:$0xff]  ;;  %v17_v16 = vld [vmem:[%s1311_s0 + $0x28] sm:$0xff] }
   0x6   :  { %984 = vmatpush3.bf16.msra.mxu1 %v974_v3  ;;  %979 = vmatprep.subr.bf16.mxu0 %v978_v7  ;;  %v49_v17 = vld [vmem:[%s1311_s0 + $0x128] sm:$0xff]  ;;  %v18_v18 = vld [vmem:[%s1311_s0 + $0x30] sm:$0xff]  ;;  %v19_v20 = vld [vmem:[%s1311_s0 + $0x38] sm:$0xff] }
   0x7   :  { %983 = vmatprep.subr.bf16.mxu1 %v978_v7  ;;  %v50_v19 = vld [vmem:[%s1311_s0 + $0x130] sm:$0xff]  ;;  %v51_v21 = vld [vmem:[%s1311_s0 + $0x138] sm:$0xff]  ;;  %v20_v22 = vld [vmem:[%s1311_s0 + $0x40] sm:$0xff] }
   0x8   :  { %v52_v23 = vld [vmem:[%s1311_s0 + $0x140] sm:$0xff] }
   0x9   :  { %981 = vmatpush3.bf16.msra.mxu0 %v978_v7 }
   0xa   :  { %985 = vmatpush3.bf16.msra.mxu1 %v978_v7 }
   0xc   :  { %879 = vmatmul.mubr.msk.f32.vlgmr.msra.gmra.mrb[0].mxu0 %vm80_vm0, %v13_v8 }
   0xd   :  { %927 = vmatmul.mubr.msk.f32.vlgmr.msra.gmra.mrb[0].mxu1 %vm80_vm0, %v45_v9  ;;  %881 = vmatprep.mubr.msk.f32.mxu0 %vm80_vm0, %v14_v10 }
   0xe   :  { %929 = vmatprep.mubr.msk.f32.mxu1 %vm80_vm0, %v46_v11 }
  0x10   :  { %882 = vmatmul.mubr.msk.f32.gmra.mrb[2].mxu0 %vm80_vm0, %v15_v12 }
  0x11   :  { %930 = vmatmul.mubr.msk.f32.gmra.mrb[2].mxu1 %vm80_vm0, %v47_v13  ;;  %884 = vmatprep.mubr.msk.f32.mxu0 %vm80_vm0, %v16_v14 }
  0x12   :  { %932 = vmatprep.mubr.msk.f32.mxu1 %vm80_vm0, %v48_v15 }
  0x14   :  { %885 = vmatmul.mubr.msk.f32.gmra.mrb[4].mxu0 %vm80_vm0, %v17_v16 }
  0x15   :  { %933 = vmatmul.mubr.msk.f32.gmra.mrb[4].mxu1 %vm80_vm0, %v49_v17  ;;  %887 = vmatprep.mubr.msk.f32.mxu0 %vm80_vm0, %v18_v18 }
  0x16   :  { %935 = vmatprep.mubr.msk.f32.mxu1 %vm80_vm0, %v50_v19 }
  0x17   :  { %7 = vsyncpa [#allocation3], 0  ;;  %v21_v24 = vld [vmem:[%s1311_s0 + $0x48] sm:$0xff]  ;;  %v22_v26 = vld [vmem:[%s1311_s0 + $0x50] sm:$0xff] }
  0x18   :  { %888 = vmatmul.mubr.msk.f32.gmra.mrb[6].mxu0 %vm80_vm0, %v19_v20  ;;  %v53_v25 = vld [vmem:[%s1311_s0 + $0x148] sm:$0xff]  ;;  %v54_v27 = vld [vmem:[%s1311_s0 + $0x150] sm:$0xff]  ;;  %v23_v28 = vld [vmem:[%s1311_s0 + $0x58] sm:$0xff] }
  0x19   :  { %936 = vmatmul.mubr.msk.f32.gmra.mrb[6].mxu1 %vm80_vm0, %v51_v21  ;;  %890 = vmatprep.mubr.msk.f32.mxu0 %vm80_vm0, %v20_v22  ;;  %v55_v29 = vld [vmem:[%s1311_s0 + $0x158] sm:$0xff]  ;;  %v24_v30 = vld [vmem:[%s1311_s0 + $0x60] sm:$0xff]  ;;  %v25_v32 = vld [vmem:[%s1311_s0 + $0x68] sm:$0xff] }
  0x1a   :  { %938 = vmatprep.mubr.msk.f32.mxu1 %vm80_vm0, %v52_v23  ;;  %v56_v31 = vld [vmem:[%s1311_s0 + $0x160] sm:$0xff]  ;;  %v57_v33 = vld [vmem:[%s1311_s0 + $0x168] sm:$0xff]  ;;  %v26_v34 = vld [vmem:[%s1311_s0 + $0x70] sm:$0xff] }
  0x1b   :  { %v58_v35 = vld [vmem:[%s1311_s0 + $0x170] sm:$0xff]  ;;  %v27_v36 = vld [vmem:[%s1311_s0 + $0x78] sm:$0xff]  ;;  %v28_v38 = vld [vmem:[%s1311_s0 + $0x80] sm:$0xff] }
  0x1c   :  { %891 = vmatmul.mubr.msk.f32.gmra.mrb[8].mxu0 %vm80_vm0, %v21_v24  ;;  %v59_v37 = vld [vmem:[%s1311_s0 + $0x178] sm:$0xff]  ;;  %v60_v39 = vld [vmem:[%s1311_s0 + $0x180] sm:$0xff]  ;;  %v29_v40 = vld [vmem:[%s1311_s0 + $0x88] sm:$0xff] }
  0x1d   :  { %939 = vmatmul.mubr.msk.f32.gmra.mrb[8].mxu1 %vm80_vm0, %v53_v25  ;;  %893 = vmatprep.mubr.msk.f32.mxu0 %vm80_vm0, %v22_v26  ;;  %v61_v41 = vld [vmem:[%s1311_s0 + $0x188] sm:$0xff]  ;;  %v30_v42 = vld [vmem:[%s1311_s0 + $0x90] sm:$0xff]  ;;  %v31_v44 = vld [vmem:[%s1311_s0 + $0x98] sm:$0xff] }
  0x1e   :  { %941 = vmatprep.mubr.msk.f32.mxu1 %vm80_vm0, %v54_v27  ;;  %v62_v43 = vld [vmem:[%s1311_s0 + $0x190] sm:$0xff]  ;;  %v63_v45 = vld [vmem:[%s1311_s0 + $0x198] sm:$0xff]  ;;  %v32_v46 = vld [vmem:[%s1311_s0 + $0xa0] sm:$0xff] }
  0x1f   :  { %v64_v47 = vld [vmem:[%s1311_s0 + $0x1a0] sm:$0xff]  ;;  %v33_v48 = vld [vmem:[%s1311_s0 + $0xa8] sm:$0xff]  ;;  %v34_v50 = vld [vmem:[%s1311_s0 + $0xb0] sm:$0xff] }
  0x20   :  { %894 = vmatmul.mubr.msk.f32.gmra.mrb[10].mxu0 %vm80_vm0, %v23_v28  ;;  %v65_v49 = vld [vmem:[%s1311_s0 + $0x1a8] sm:$0xff]  ;;  %v66_v51 = vld [vmem:[%s1311_s0 + $0x1b0] sm:$0xff]  ;;  %v35_v52 = vld [vmem:[%s1311_s0 + $0xb8] sm:$0xff] }
  0x21   :  { %942 = vmatmul.mubr.msk.f32.gmra.mrb[10].mxu1 %vm80_vm0, %v55_v29  ;;  %896 = vmatprep.mubr.msk.f32.mxu0 %vm80_vm0, %v24_v30  ;;  %v67_v53 = vld [vmem:[%s1311_s0 + $0x1b8] sm:$0xff]  ;;  %v36_v54 = vld [vmem:[%s1311_s0 + $0xc0] sm:$0xff]  ;;  %v37_v56 = vld [vmem:[%s1311_s0 + $0xc8] sm:$0xff] }
  0x22   :  { %944 = vmatprep.mubr.msk.f32.mxu1 %vm80_vm0, %v56_v31  ;;  %v68_v55 = vld [vmem:[%s1311_s0 + $0x1c0] sm:$0xff]  ;;  %v69_v57 = vld [vmem:[%s1311_s0 + $0x1c8] sm:$0xff]  ;;  %v38_v58 = vld [vmem:[%s1311_s0 + $0xd0] sm:$0xff] }
  0x23   :  { %v70_v59 = vld [vmem:[%s1311_s0 + $0x1d0] sm:$0xff]  ;;  %v39_v60 = vld [vmem:[%s1311_s0 + $0xd8] sm:$0xff]  ;;  %v40_v62 = vld [vmem:[%s1311_s0 + $0xe0] sm:$0xff] }
  0x24   :  { %897 = vmatmul.mubr.msk.f32.gmra.mrb[12].mxu0 %vm80_vm0, %v25_v32  ;;  %v71_v61 = vld [vmem:[%s1311_s0 + $0x1d8] sm:$0xff]  ;;  %v72_v63 = vld [vmem:[%s1311_s0 + $0x1e0] sm:$0xff]  ;;  %v41_v0 = vld [vmem:[%s1311_s0 + $0xe8] sm:$0xff] }
  0x25   :  { %945 = vmatmul.mubr.msk.f32.gmra.mrb[12].mxu1 %vm80_vm0, %v57_v33  ;;  %899 = vmatprep.mubr.msk.f32.mxu0 %vm80_vm0, %v26_v34  ;;  %v73_v1 = vld [vmem:[%s1311_s0 + $0x1e8] sm:$0xff]  ;;  %v42_v2 = vld [vmem:[%s1311_s0 + $0xf0] sm:$0xff]  ;;  %v43_v4 = vld [vmem:[%s1311_s0 + $0xf8] sm:$0xff] }
  0x26   :  { %947 = vmatprep.mubr.msk.f32.mxu1 %vm80_vm0, %v58_v35  ;;  %v74_v3 = vld [vmem:[%s1311_s0 + $0x1f0] sm:$0xff]  ;;  %v75_v5 = vld [vmem:[%s1311_s0 + $0x1f8] sm:$0xff]  ;;  %s1013_s0 = smov [#allocation2]  }
  0x27   :  { %s727_s28 = sshll.u32 %s1013_s0, 4  ;;  %s728_s28 = int_to_ptr.vmem [resolvable:$true] %s727_s28 }
  0x28   :  { %900 = vmatmul.mubr.msk.f32.gmra.mrb[14].mxu0 %vm80_vm0, %v27_v36  ;;  %s989_s29 = scalar_lea.vmem %s728_s28, 8192  ;;  %p994_p1 = scmp.lt.s32.totalorder %s728_s28, %s728_s28 }
  0x29   :  { %948 = vmatmul.mubr.msk.f32.gmra.mrb[14].mxu1 %vm80_vm0, %v59_v37  ;;  %902 = vmatprep.mubr.msk.f32.mxu0 %vm80_vm0, %v28_v38  ;;  %p990_p0 = scmp.ne.s32.totalorder %s728_s28, %s989_s29  ;;  %p995_p2 = scmp.lt.s32.totalorder %s989_s29, %s989_s29 }
  0x2a   :  { %950 = vmatprep.mubr.msk.f32.mxu1 %vm80_vm0, %v60_v39 }
  0x2b   :  { %p996_p3 = por %p995_p2, %p994_p1 }
  0x2c   :  { %903 = vmatmul.mubr.msk.f32.gmra.mrb[16].mxu0 %vm80_vm0, %v29_v40 }
  0x2d   :  { %951 = vmatmul.mubr.msk.f32.gmra.mrb[16].mxu1 %vm80_vm0, %v61_v41  ;;  %905 = vmatprep.mubr.msk.f32.mxu0 %vm80_vm0, %v30_v42  ;;  %p997_p4 = pnand %p996_p3, %p990_p0 }
  0x2e   :  { %953 = vmatprep.mubr.msk.f32.mxu1 %vm80_vm0, %v62_v43 }
  0x30   :  { %906 = vmatmul.mubr.msk.f32.gmra.mrb[18].mxu0 %vm80_vm0, %v31_v44 }
  0x31   :  { %954 = vmatmul.mubr.msk.f32.gmra.mrb[18].mxu1 %vm80_vm0, %v63_v45  ;;  %908 = vmatprep.mubr.msk.f32.mxu0 %vm80_vm0, %v32_v46 }
  0x32   :  { %956 = vmatprep.mubr.msk.f32.mxu1 %vm80_vm0, %v64_v47 }
  0x34   :  { %909 = vmatmul.mubr.msk.f32.gmra.mrb[20].mxu0 %vm80_vm0, %v33_v48 }
  0x35   :  { %957 = vmatmul.mubr.msk.f32.gmra.mrb[20].mxu1 %vm80_vm0, %v65_v49  ;;  %911 = vmatprep.mubr.msk.f32.mxu0 %vm80_vm0, %v34_v50 }
  0x36   :  { %959 = vmatprep.mubr.msk.f32.mxu1 %vm80_vm0, %v66_v51 }
  0x38   :  { %912 = vmatmul.mubr.msk.f32.gmra.mrb[22].mxu0 %vm80_vm0, %v35_v52 }
  0x39   :  { %960 = vmatmul.mubr.msk.f32.gmra.mrb[22].mxu1 %vm80_vm0, %v67_v53  ;;  %914 = vmatprep.mubr.msk.f32.mxu0 %vm80_vm0, %v36_v54 }
  0x3a   :  { %962 = vmatprep.mubr.msk.f32.mxu1 %vm80_vm0, %v68_v55 }
  0x3c   :  { %915 = vmatmul.mubr.msk.f32.gmra.mrb[24].mxu0 %vm80_vm0, %v37_v56 }
  0x3d   :  { %963 = vmatmul.mubr.msk.f32.gmra.mrb[24].mxu1 %vm80_vm0, %v69_v57  ;;  %917 = vmatprep.mubr.msk.f32.mxu0 %vm80_vm0, %v38_v58 }
  0x3e   :  { %965 = vmatprep.mubr.msk.f32.mxu1 %vm80_vm0, %v70_v59 }
  0x40   :  { %918 = vmatmul.mubr.msk.f32.gmra.mrb[26].mxu0 %vm80_vm0, %v39_v60 }
  0x41   :  { %966 = vmatmul.mubr.msk.f32.gmra.mrb[26].mxu1 %vm80_vm0, %v71_v61  ;;  %920 = vmatprep.mubr.msk.f32.mxu0 %vm80_vm0, %v40_v62 }
  0x42   :  { %968 = vmatprep.mubr.msk.f32.mxu1 %vm80_vm0, %v72_v63 }
  0x44   :  { %921 = vmatmul.mubr.msk.f32.gmra.mrb[28].mxu0 %vm80_vm0, %v41_v0 }
  0x45   :  { %969 = vmatmul.mubr.msk.f32.gmra.mrb[28].mxu1 %vm80_vm0, %v73_v1  ;;  %923 = vmatprep.mubr.msk.f32.mxu0 %vm80_vm0, %v42_v2 }
  0x46   :  { %971 = vmatprep.mubr.msk.f32.mxu1 %vm80_vm0, %v74_v3 }
  0x48   :  { %924 = vmatmul.mubr.msk.f32.gmra.mrb[30].mxu0 %vm80_vm0, %v43_v4 }
  0x49   :  { %972 = vmatmul.mubr.msk.f32.gmra.mrb[30].mxu1 %vm80_vm0, %v75_v5 }
  0xdf   :  { %v880_v6 = vpop.f32.mrb[0].mxu0 }
  0xe0   :  { %v928_v7 = vpop.f32.mrb[0].mxu1  ;;  %659 = vst [vmem:[#allocation2 + $0x8] sm:$0xff] %v880_v6  ;;  %v339_v8 = vpop.f32.mrb[1].mxu0 }
  0xe1   :  { %691 = vst [vmem:[#allocation2 + $0x108] sm:$0xff] %v928_v7  ;;  %v499_v9 = vpop.f32.mrb[1].mxu1  ;;  %658 = vst [vmem:[#allocation2] sm:$0xff] %v339_v8 }
  0xe2   :  { %690 = vst [vmem:[#allocation2 + $0x100] sm:$0xff] %v499_v9 }
  0xe3   :  { %v883_v10 = vpop.f32.mrb[2].mxu0 }
  0xe4   :  { %v931_v11 = vpop.f32.mrb[2].mxu1  ;;  %661 = vst [vmem:[#allocation2 + $0x18] sm:$0xff] %v883_v10  ;;  %v349_v12 = vpop.f32.mrb[3].mxu0 }
  0xe5   :  { %693 = vst [vmem:[#allocation2 + $0x118] sm:$0xff] %v931_v11  ;;  %v509_v13 = vpop.f32.mrb[3].mxu1  ;;  %660 = vst [vmem:[#allocation2 + $0x10] sm:$0xff] %v349_v12 }
  0xe6   :  { %692 = vst [vmem:[#allocation2 + $0x110] sm:$0xff] %v509_v13 }
  0xe7   :  { %v886_v14 = vpop.f32.mrb[4].mxu0 }
  0xe8   :  { %v934_v15 = vpop.f32.mrb[4].mxu1  ;;  %663 = vst [vmem:[#allocation2 + $0x28] sm:$0xff] %v886_v14  ;;  %v359_v16 = vpop.f32.mrb[5].mxu0 }
  0xe9   :  { %695 = vst [vmem:[#allocation2 + $0x128] sm:$0xff] %v934_v15  ;;  %v519_v17 = vpop.f32.mrb[5].mxu1  ;;  %662 = vst [vmem:[#allocation2 + $0x20] sm:$0xff] %v359_v16 }
  0xea   :  { %694 = vst [vmem:[#allocation2 + $0x120] sm:$0xff] %v519_v17 }
  0xeb   :  { %v889_v18 = vpop.f32.mrb[6].mxu0 }
  0xec   :  { %v937_v19 = vpop.f32.mrb[6].mxu1  ;;  %665 = vst [vmem:[#allocation2 + $0x38] sm:$0xff] %v889_v18  ;;  %v369_v20 = vpop.f32.mrb[7].mxu0 }
  0xed   :  { %697 = vst [vmem:[#allocation2 + $0x138] sm:$0xff] %v937_v19  ;;  %v529_v21 = vpop.f32.mrb[7].mxu1  ;;  %664 = vst [vmem:[#allocation2 + $0x30] sm:$0xff] %v369_v20 }
  0xee   :  { %696 = vst [vmem:[#allocation2 + $0x130] sm:$0xff] %v529_v21 }
  0xef   :  { %v892_v22 = vpop.f32.mrb[8].mxu0 }
  0xf0   :  { %v940_v23 = vpop.f32.mrb[8].mxu1  ;;  %667 = vst [vmem:[#allocation2 + $0x48] sm:$0xff] %v892_v22  ;;  %v379_v24 = vpop.f32.mrb[9].mxu0 }
  0xf1   :  { %699 = vst [vmem:[#allocation2 + $0x148] sm:$0xff] %v940_v23  ;;  %v539_v25 = vpop.f32.mrb[9].mxu1  ;;  %666 = vst [vmem:[#allocation2 + $0x40] sm:$0xff] %v379_v24 }
  0xf2   :  { %698 = vst [vmem:[#allocation2 + $0x140] sm:$0xff] %v539_v25 }
  0xf3   :  { %v895_v26 = vpop.f32.mrb[10].mxu0 }
  0xf4   :  { %v943_v27 = vpop.f32.mrb[10].mxu1  ;;  %669 = vst [vmem:[#allocation2 + $0x58] sm:$0xff] %v895_v26  ;;  %v389_v28 = vpop.f32.mrb[11].mxu0 }
  0xf5   :  { %701 = vst [vmem:[#allocation2 + $0x158] sm:$0xff] %v943_v27  ;;  %v549_v29 = vpop.f32.mrb[11].mxu1  ;;  %668 = vst [vmem:[#allocation2 + $0x50] sm:$0xff] %v389_v28 }
  0xf6   :  { %700 = vst [vmem:[#allocation2 + $0x150] sm:$0xff] %v549_v29 }
  0xf7   :  { %v898_v30 = vpop.f32.mrb[12].mxu0 }
  0xf8   :  { %v946_v31 = vpop.f32.mrb[12].mxu1  ;;  %671 = vst [vmem:[#allocation2 + $0x68] sm:$0xff] %v898_v30  ;;  %v399_v32 = vpop.f32.mrb[13].mxu0 }
  0xf9   :  { %703 = vst [vmem:[#allocation2 + $0x168] sm:$0xff] %v946_v31  ;;  %v559_v33 = vpop.f32.mrb[13].mxu1  ;;  %670 = vst [vmem:[#allocation2 + $0x60] sm:$0xff] %v399_v32 }
  0xfa   :  { %702 = vst [vmem:[#allocation2 + $0x160] sm:$0xff] %v559_v33 }
  0xfb   :  { %v901_v34 = vpop.f32.mrb[14].mxu0 }
  0xfc   :  { %v949_v35 = vpop.f32.mrb[14].mxu1  ;;  %673 = vst [vmem:[#allocation2 + $0x78] sm:$0xff] %v901_v34  ;;  %v409_v36 = vpop.f32.mrb[15].mxu0 }
  0xfd   :  { %705 = vst [vmem:[#allocation2 + $0x178] sm:$0xff] %v949_v35  ;;  %v569_v37 = vpop.f32.mrb[15].mxu1  ;;  %672 = vst [vmem:[#allocation2 + $0x70] sm:$0xff] %v409_v36 }
  0xfe   :  { %704 = vst [vmem:[#allocation2 + $0x170] sm:$0xff] %v569_v37 }
  0xff   :  { %v904_v38 = vpop.f32.mrb[16].mxu0 }
 0x100   :  { %v952_v39 = vpop.f32.mrb[16].mxu1  ;;  %675 = vst [vmem:[#allocation2 + $0x88] sm:$0xff] %v904_v38  ;;  %v419_v40 = vpop.f32.mrb[17].mxu0 }
 0x101   :  { %707 = vst [vmem:[#allocation2 + $0x188] sm:$0xff] %v952_v39  ;;  %v579_v41 = vpop.f32.mrb[17].mxu1  ;;  %674 = vst [vmem:[#allocation2 + $0x80] sm:$0xff] %v419_v40 }
 0x102   :  { %706 = vst [vmem:[#allocation2 + $0x180] sm:$0xff] %v579_v41 }
 0x103   :  { %v907_v42 = vpop.f32.mrb[18].mxu0 }
 0x104   :  { %v955_v43 = vpop.f32.mrb[18].mxu1  ;;  %677 = vst [vmem:[#allocation2 + $0x98] sm:$0xff] %v907_v42  ;;  %v429_v44 = vpop.f32.mrb[19].mxu0 }
 0x105   :  { %709 = vst [vmem:[#allocation2 + $0x198] sm:$0xff] %v955_v43  ;;  %v589_v45 = vpop.f32.mrb[19].mxu1  ;;  %676 = vst [vmem:[#allocation2 + $0x90] sm:$0xff] %v429_v44 }
 0x106   :  { %708 = vst [vmem:[#allocation2 + $0x190] sm:$0xff] %v589_v45 }
 0x107   :  { %v910_v46 = vpop.f32.mrb[20].mxu0 }
 0x108   :  { %v958_v47 = vpop.f32.mrb[20].mxu1  ;;  %679 = vst [vmem:[#allocation2 + $0xa8] sm:$0xff] %v910_v46  ;;  %v439_v48 = vpop.f32.mrb[21].mxu0 }
 0x109   :  { %711 = vst [vmem:[#allocation2 + $0x1a8] sm:$0xff] %v958_v47  ;;  %v599_v49 = vpop.f32.mrb[21].mxu1  ;;  %678 = vst [vmem:[#allocation2 + $0xa0] sm:$0xff] %v439_v48 }
 0x10a   :  { %710 = vst [vmem:[#allocation2 + $0x1a0] sm:$0xff] %v599_v49 }
 0x10b   :  { %v913_v50 = vpop.f32.mrb[22].mxu0 }
 0x10c   :  { %v961_v51 = vpop.f32.mrb[22].mxu1  ;;  %681 = vst [vmem:[#allocation2 + $0xb8] sm:$0xff] %v913_v50  ;;  %v449_v52 = vpop.f32.mrb[23].mxu0 }
 0x10d   :  { %713 = vst [vmem:[#allocation2 + $0x1b8] sm:$0xff] %v961_v51  ;;  %v609_v53 = vpop.f32.mrb[23].mxu1  ;;  %680 = vst [vmem:[#allocation2 + $0xb0] sm:$0xff] %v449_v52 }
 0x10e   :  { %712 = vst [vmem:[#allocation2 + $0x1b0] sm:$0xff] %v609_v53 }
 0x10f   :  { %v916_v54 = vpop.f32.mrb[24].mxu0 }
 0x110   :  { %v964_v55 = vpop.f32.mrb[24].mxu1  ;;  %683 = vst [vmem:[#allocation2 + $0xc8] sm:$0xff] %v916_v54  ;;  %v459_v56 = vpop.f32.mrb[25].mxu0 }
 0x111   :  { %715 = vst [vmem:[#allocation2 + $0x1c8] sm:$0xff] %v964_v55  ;;  %v619_v57 = vpop.f32.mrb[25].mxu1  ;;  %682 = vst [vmem:[#allocation2 + $0xc0] sm:$0xff] %v459_v56 }
 0x112   :  { %714 = vst [vmem:[#allocation2 + $0x1c0] sm:$0xff] %v619_v57 }
 0x113   :  { %v919_v58 = vpop.f32.mrb[26].mxu0 }
 0x114   :  { %v967_v59 = vpop.f32.mrb[26].mxu1  ;;  %685 = vst [vmem:[#allocation2 + $0xd8] sm:$0xff] %v919_v58  ;;  %v469_v60 = vpop.f32.mrb[27].mxu0 }
 0x115   :  { %717 = vst [vmem:[#allocation2 + $0x1d8] sm:$0xff] %v967_v59  ;;  %v629_v61 = vpop.f32.mrb[27].mxu1  ;;  %684 = vst [vmem:[#allocation2 + $0xd0] sm:$0xff] %v469_v60 }
 0x116   :  { %716 = vst [vmem:[#allocation2 + $0x1d0] sm:$0xff] %v629_v61 }
 0x117   :  { %v922_v62 = vpop.f32.mrb[28].mxu0 }
 0x118   :  { %v970_v63 = vpop.f32.mrb[28].mxu1  ;;  %687 = vst [vmem:[#allocation2 + $0xe8] sm:$0xff] %v922_v62  ;;  %v479_v0 = vpop.f32.mrb[29].mxu0 }
 0x119   :  { %719 = vst [vmem:[#allocation2 + $0x1e8] sm:$0xff] %v970_v63  ;;  %v639_v1 = vpop.f32.mrb[29].mxu1  ;;  %686 = vst [vmem:[#allocation2 + $0xe0] sm:$0xff] %v479_v0 }
 0x11a   :  { %718 = vst [vmem:[#allocation2 + $0x1e0] sm:$0xff] %v639_v1 }
 0x11b   :  { %v925_v2 = vpop.f32.mrb[30].mxu0 }
 0x11c   :  { %v973_v3 = vpop.f32.mrb[30].mxu1  ;;  %689 = vst [vmem:[#allocation2 + $0xf8] sm:$0xff] %v925_v2  ;;  %v489_v4 = vpop.f32.mrb[31].mxu0 }
 0x11d   :  { %721 = vst [vmem:[#allocation2 + $0x1f8] sm:$0xff] %v973_v3  ;;  %v649_v5 = vpop.f32.mrb[31].mxu1  ;;  %688 = vst [vmem:[#allocation2 + $0xf0] sm:$0xff] %v489_v4 }
 0x11e   :  { %720 = vst [vmem:[#allocation2 + $0x1f0] sm:$0xff] %v649_v5 }
 0x11f   :  { %1000 = shalt.err (!%p997_p4)
}
 0x120   :  { %s1001_s4 = scalar_lea.hbm %s1313_s2, 8192 }
 0x121   :  { %p1002_p5 = scmp.ne.s32.totalorder %s1313_s2, %s1001_s4  ;;  %p1005_p6 = scmp.lt.u32.totalorder %s1001_s4, %s1313_s2 }
 0x123   :  { %p1007_p7 = pnand %p1005_p6, %p1002_p5 }
 0x125   :  { %1010 = shalt.err (!%p1007_p7)
}
 0x126   :  { %s1014_s9 = smov 128   ;;  %s1015_s10 = smov 8  }
 0x127   :  { %733 = dma.vmem_to_hbm [thread:$0]  %s728_s28, 8192, %s1313_s2, [#allocation3], %s1014_s9, %s1014_s9, %s1015_s10  }
 0x128   :  { %1011 = dma.done.wait [#allocation3], 8192  }
 0x129   :  { %1012 = vsyncadd [#allocation3], 4294959104 }
 0x12a   :  { %737 = vsyncpa [#allocation3], 1 }

</bundles_post_ra>
